<compile_context>
chip_gen: v6e
topology: v6e:2x2x1
jax: 0.10.0
libtpu: 0.0.40
codegen_flags: <defaults>
</compile_context>

<pallas_src>
import jax
import jax.numpy as jnp
from jax import lax
from jax.experimental import pallas as pl
from jax.experimental.pallas import tpu as pltpu


N_HIDDEN1, N_HIDDEN2, N_OUT = 10, 8, 1


def wine_mlp_kernel(x_ref, w1_ref, b1_ref, w2_ref, b2_ref, w3_ref, b3_ref,
                    o_ref):
    """One batch tile of the fused MLP forward.

    x_ref: (T, n_in) f32 -- batch on sublanes, features on lanes (native layout)
    w*:    PyTorch-shaped (out, in) weights; b*: (out, 1) bias columns
    o_ref: (1, T)  f32   -- lane-dense sigmoid outputs for this tile
    """
    x = x_ref[...]

    # hidden1: contract the feature axis of BOTH operands on the MXU, so the
    # result comes out batch-on-lanes:  h1[o, t] = sum_k w1[o, k] * x[t, k]
    # -> (10, T), lane-dense.  No explicit transpose of the big x tile.
    h1 = lax.dot_general(w1_ref[...], x, (((1,), (1,)), ((), ())),
                         preferred_element_type=jnp.float32)
    h1 = jnp.maximum(h1 + b1_ref[...], 0.0)          # bias + ReLU, f32 on VPU

    # hidden2: (8, 10) @ (10, T) -> (8, T), lane-dense, f32 throughout.
    h2 = jnp.dot(w2_ref[...], h1, preferred_element_type=jnp.float32)
    h2 = jnp.maximum(h2 + b2_ref[...], 0.0)

    # hidden3: (1, 8) @ (8, T) -> (1, T), lane-dense.
    h3 = jnp.dot(w3_ref[...], h2, preferred_element_type=jnp.float32)
    h3 = h3 + b3_ref[...]

    # Sigmoid: exp on the EUP + approximate EUP reciprocal (intentional
    # precision trade, rel. err ~1e-4).
    o_ref[...] = pl.reciprocal(1.0 + jnp.exp(-h3), approx=True)


def _pick_batch_tile(batch, t_cap):
    """Choose (tile, n_tiles) for the 1-D batch grid.

    Small batches -> a single block equal to the full array (no padding, no
    ragged blocks, one grid step).  Larger batches -> 128-lane-aligned tiles,
    capped at `t_cap`, with at least 2 tiles so v7x's two TensorCores both get
    work on the "parallel" grid axis.  A non-dividing last tile relies on
    Pallas boundary handling: padded input rows stay row/lane-isolated through
    the MLP and out-of-range output lanes are discarded on store.
    """
    if batch <= 1024:
        return batch, 1
    n_tiles = max(2, pl.cdiv(batch, t_cap))
    tile = pl.cdiv(pl.cdiv(batch, n_tiles), 128) * 128
    return tile, pl.cdiv(batch, tile)


def wine_quality_forward(x, params, *, t_cap=32768):
    """Fused forward pass.  x: (B, n_inputs) f32 -> (B, 1) f32 sigmoid outputs.

    x is consumed in its native layout (no wrapper transpose / cast / pad HBM
    passes).  On v6e with very large batches, t_cap can be raised (together
    with CompilerParams(vmem_limit_bytes=...)); the 32768 default fits the
    32 MiB scoped-VMEM default on every generation, including v7x.
    """
    assert t_cap % 128 == 0 and t_cap >= 128
    B, n_in = x.shape
    f32 = jnp.float32

    x = x.astype(f32)
    w1 = params["w1"].astype(f32)   # (10, n_in)
    b1 = params["b1"].astype(f32)   # (10, 1)
    w2 = params["w2"].astype(f32)   # (8, 10)
    b2 = params["b2"].astype(f32)   # (8, 1)
    w3 = params["w3"].astype(f32)   # (1, 8)
    b3 = params["b3"].astype(f32)   # (1, 1)

    T, n_tiles = _pick_batch_tile(B, t_cap)

    resident = lambda a: pl.BlockSpec(a.shape, lambda i: (0, 0))

    cost = pl.CostEstimate(
        flops=2 * B * (n_in * N_HIDDEN1 + N_HIDDEN1 * N_HIDDEN2
                       + N_HIDDEN2 * N_OUT),
        transcendentals=2 * B,                       # exp + reciprocal per row
        bytes_accessed=4 * (B * n_in + B             # x read + out write
                            + N_HIDDEN1 * (n_in + 1)
                            + N_HIDDEN2 * (N_HIDDEN1 + 1)
                            + N_OUT * (N_HIDDEN2 + 1)),
    )

    out = pl.pallas_call(
        wine_mlp_kernel,
        out_shape=jax.ShapeDtypeStruct((1, B), f32),
        grid=(n_tiles,),
        in_specs=[
            pl.BlockSpec((T, n_in), lambda i: (i, 0)),   # x tile steps w/ grid
            resident(w1), resident(b1),
            resident(w2), resident(b2),
            resident(w3), resident(b3),
        ],
        out_specs=pl.BlockSpec((1, T), lambda i: (0, i)),  # lane-dense store
        compiler_params=pltpu.CompilerParams(
            dimension_semantics=("parallel",)),
        cost_estimate=cost,
    )(x, w1, b1, w2, b2, w3, b3)

    # (1, B) -> (B, 1): same row-major data order, PyTorch-style result shape.
    return out.reshape(B, 1)


def init_params(key, n_inputs):
    """Deterministic synthetic init matching the PyTorch layer shapes.

    Weights are stored PyTorch-style (out_features, in_features); biases as
    (out_features, 1) columns (they broadcast across the lane/batch axis in
    the kernel).
    """
    k1, k2, k3, kb1, kb2, kb3 = jax.random.split(key, 6)

    def kaiming_uniform(k, fan_in, shape):
        bound = jnp.sqrt(2.0) * jnp.sqrt(3.0 / fan_in)
        return jax.random.uniform(k, shape, jnp.float32, -bound, bound)

    def xavier_uniform(k, fan_in, fan_out, shape):
        bound = jnp.sqrt(6.0 / (fan_in + fan_out))
        return jax.random.uniform(k, shape, jnp.float32, -bound, bound)

    def bias_uniform(k, fan_in, shape):
        bound = 1.0 / jnp.sqrt(fan_in)
        return jax.random.uniform(k, shape, jnp.float32, -bound, bound)

    return {
        "w1": kaiming_uniform(k1, n_inputs, (N_HIDDEN1, n_inputs)),
        "b1": bias_uniform(kb1, n_inputs, (N_HIDDEN1, 1)),
        "w2": kaiming_uniform(k2, N_HIDDEN1, (N_HIDDEN2, N_HIDDEN1)),
        "b2": bias_uniform(kb2, N_HIDDEN1, (N_HIDDEN2, 1)),
        "w3": xavier_uniform(k3, N_HIDDEN2, N_OUT, (N_OUT, N_HIDDEN2)),
        "b3": bias_uniform(kb3, N_HIDDEN2, (N_OUT, 1)),
    }


def reference_forward(x, params):
    """Pure-JAX f32 reference of the module's forward pass."""
    h1 = jnp.maximum(x @ params["w1"].T + params["b1"].T, 0.0)
    h2 = jnp.maximum(h1 @ params["w2"].T + params["b2"].T, 0.0)
    return jax.nn.sigmoid(h2 @ params["w3"].T + params["b3"].T)


if __name__ == "__main__":
    key = jax.random.PRNGKey(0)
    kx1, kx2, kp = jax.random.split(key, 3)

    n_inputs = 11     # wine-quality dataset has 11 features
    params = init_params(kp, n_inputs)

    # Small batch: single grid step, block == full array (batch need not be a
    # multiple of 8/128, no padding anywhere).
    batch1 = 1000
    x1 = jax.random.normal(kx1, (batch1, n_inputs), dtype=jnp.float32)
    out1 = jax.block_until_ready(wine_quality_forward(x1, params))

    # Larger batch: two "parallel" grid steps of 1024 lanes (multi-tile path).
    batch2 = 2048
    x2 = jax.random.normal(kx2, (batch2, n_inputs), dtype=jnp.float32)
    out2 = jax.block_until_ready(wine_quality_forward(x2, params))

    for x, out in ((x1, out1), (x2, out2)):
        assert out.shape == (x.shape[0], 1)
        assert bool(jnp.all(jnp.isfinite(out)))
        ref = reference_forward(x, params)
        err = float(jnp.max(jnp.abs(out - ref)))
        # All-f32 compute; remaining error is MXU default precision plus the
        # EUP approximate reciprocal inside the sigmoid.
        assert err < 2e-2, err

    print("KERNEL_OK")
</pallas_src>

<mosaic_0001>
module attributes {stable_mosaic.version = 11 : i64} {
  func.func @wine_mlp_kernel(%arg0: i32, %arg1: memref<1000x11xf32, #tpu.memory_space<vmem>>, %arg2: memref<10x11xf32, #tpu.memory_space<vmem>>, %arg3: memref<10x1xf32, #tpu.memory_space<vmem>>, %arg4: memref<8x10xf32, #tpu.memory_space<vmem>>, %arg5: memref<8x1xf32, #tpu.memory_space<vmem>>, %arg6: memref<1x8xf32, #tpu.memory_space<vmem>>, %arg7: memref<1x1xf32, #tpu.memory_space<vmem>>, %arg8: memref<1x1000xf32, #tpu.memory_space<vmem>>) attributes {dimension_semantics = [#tpu.dimension_semantics<parallel>], iteration_bounds = array<i64: 1>, scalar_prefetch = 0 : i64, scratch_operands = 0 : i64, tpu.core_type = #tpu.core_type<tc>, window_params = [{transform_indices = @transform_0, window_bounds = array<i64: 1000, 11>}, {pipeline_mode = #tpu.pipeline_mode<synchronous>, transform_indices = @transform_1, window_bounds = array<i64: 10, 11>}, {pipeline_mode = #tpu.pipeline_mode<synchronous>, transform_indices = @transform_2, window_bounds = array<i64: 10, 1>}, {pipeline_mode = #tpu.pipeline_mode<synchronous>, transform_indices = @transform_3, window_bounds = array<i64: 8, 10>}, {pipeline_mode = #tpu.pipeline_mode<synchronous>, transform_indices = @transform_4, window_bounds = array<i64: 8, 1>}, {pipeline_mode = #tpu.pipeline_mode<synchronous>, transform_indices = @transform_5, window_bounds = array<i64: 1, 8>}, {pipeline_mode = #tpu.pipeline_mode<synchronous>, transform_indices = @transform_6, window_bounds = array<i64: 1, 1>}, {transform_indices = @transform_7, window_bounds = array<i64: 1, 1000>}]} {
    %c0 = arith.constant 0 : index
    %c0_0 = arith.constant 0 : index
    %0 = vector.load %arg1[%c0, %c0_0] : memref<1000x11xf32, #tpu.memory_space<vmem>>, vector<1000x11xf32>
    %c0_1 = arith.constant 0 : index
    %c0_2 = arith.constant 0 : index
    %1 = vector.load %arg2[%c0_1, %c0_2] : memref<10x11xf32, #tpu.memory_space<vmem>>, vector<10x11xf32>
    %cst = arith.constant dense<0.000000e+00> : vector<10x1000xf32>
    %2 = tpu.matmul %1, %0, %cst {dimension_numbers = #tpu.dot_dimension_numbers<[1], [1], [0], [0], [0, 0, 1, 0], [], []>} : vector<10x11xf32>, vector<1000x11xf32>, vector<10x1000xf32> -> vector<10x1000xf32>
    %c0_3 = arith.constant 0 : index
    %c0_4 = arith.constant 0 : index
    %3 = vector.load %arg3[%c0_3, %c0_4] : memref<10x1xf32, #tpu.memory_space<vmem>>, vector<10x1xf32>
    %4 = vector.broadcast %3 : vector<10x1xf32> to vector<10x1000xf32>
    %5 = arith.addf %2, %4 : vector<10x1000xf32>
    %cst_5 = arith.constant 0.000000e+00 : f32
    %6 = vector.broadcast %cst_5 : f32 to vector<10x1000xf32>
    %7 = arith.maximumf %5, %6 : vector<10x1000xf32>
    %c0_6 = arith.constant 0 : index
    %c0_7 = arith.constant 0 : index
    %8 = vector.load %arg4[%c0_6, %c0_7] : memref<8x10xf32, #tpu.memory_space<vmem>>, vector<8x10xf32>
    %cst_8 = arith.constant dense<0.000000e+00> : vector<8x1000xf32>
    %9 = tpu.matmul %8, %7, %cst_8 {dimension_numbers = #tpu.dot_dimension_numbers<[1], [0], [0], [1], [0, 0, 1, 1], [], []>} : vector<8x10xf32>, vector<10x1000xf32>, vector<8x1000xf32> -> vector<8x1000xf32>
    %c0_9 = arith.constant 0 : index
    %c0_10 = arith.constant 0 : index
    %10 = vector.load %arg5[%c0_9, %c0_10] : memref<8x1xf32, #tpu.memory_space<vmem>>, vector<8x1xf32>
    %11 = vector.broadcast %10 : vector<8x1xf32> to vector<8x1000xf32>
    %12 = arith.addf %9, %11 : vector<8x1000xf32>
    %cst_11 = arith.constant 0.000000e+00 : f32
    %13 = vector.broadcast %cst_11 : f32 to vector<8x1000xf32>
    %14 = arith.maximumf %12, %13 : vector<8x1000xf32>
    %c0_12 = arith.constant 0 : index
    %c0_13 = arith.constant 0 : index
    %15 = vector.load %arg6[%c0_12, %c0_13] : memref<1x8xf32, #tpu.memory_space<vmem>>, vector<1x8xf32>
    %cst_14 = arith.constant dense<0.000000e+00> : vector<1x1000xf32>
    %16 = tpu.matmul %15, %14, %cst_14 {dimension_numbers = #tpu.dot_dimension_numbers<[1], [0], [0], [1], [0, 0, 1, 1], [], []>} : vector<1x8xf32>, vector<8x1000xf32>, vector<1x1000xf32> -> vector<1x1000xf32>
    %c0_15 = arith.constant 0 : index
    %c0_16 = arith.constant 0 : index
    %17 = vector.load %arg7[%c0_15, %c0_16] : memref<1x1xf32, #tpu.memory_space<vmem>>, vector<1x1xf32>
    %18 = vector.broadcast %17 : vector<1x1xf32> to vector<1x1000xf32>
    %19 = arith.addf %16, %18 : vector<1x1000xf32>
    %cst_17 = arith.constant 0.000000e+00 : f32
    %20 = vector.broadcast %cst_17 : f32 to vector<1x1000xf32>
    %21 = arith.subf %20, %19 : vector<1x1000xf32>
    %22 = math.exp %21 : vector<1x1000xf32>
    %cst_18 = arith.constant 1.000000e+00 : f32
    %23 = vector.broadcast %cst_18 : f32 to vector<1x1000xf32>
    %24 = arith.addf %23, %22 : vector<1x1000xf32>
    %25 = tpu.reciprocal %24 {approx = true} : vector<1x1000xf32> -> vector<1x1000xf32>
    %c0_19 = arith.constant 0 : index
    %c0_20 = arith.constant 0 : index
    %26 = vector.load %arg8[%c0_19, %c0_20] : memref<1x1000xf32, #tpu.memory_space<vmem>>, vector<1x1000xf32>
    tpu.vector_store %arg8[%c0_19, %c0_20], %25 {strides = array<i32>} : memref<1x1000xf32, #tpu.memory_space<vmem>>, vector<1x1000xf32>,
    return
  }
  func.func @transform_0(%arg0: i32) -> (i32, i32) {
    %c0_i32 = arith.constant 0 : i32
    %c0_i32_0 = arith.constant 0 : i32
    return %arg0, %c0_i32 : i32, i32
  }
  func.func @transform_1(%arg0: i32) -> (i32, i32) {
    %c0_i32 = arith.constant 0 : i32
    %c0_i32_0 = arith.constant 0 : i32
    %c0_i32_1 = arith.constant 0 : i32
    return %c0_i32, %c0_i32_0 : i32, i32
  }
  func.func @transform_2(%arg0: i32) -> (i32, i32) {
    %c0_i32 = arith.constant 0 : i32
    %c0_i32_0 = arith.constant 0 : i32
    %c0_i32_1 = arith.constant 0 : i32
    return %c0_i32, %c0_i32_0 : i32, i32
  }
  func.func @transform_3(%arg0: i32) -> (i32, i32) {
    %c0_i32 = arith.constant 0 : i32
    %c0_i32_0 = arith.constant 0 : i32
    %c0_i32_1 = arith.constant 0 : i32
    return %c0_i32, %c0_i32_0 : i32, i32
  }
  func.func @transform_4(%arg0: i32) -> (i32, i32) {
    %c0_i32 = arith.constant 0 : i32
    %c0_i32_0 = arith.constant 0 : i32
    %c0_i32_1 = arith.constant 0 : i32
    return %c0_i32, %c0_i32_0 : i32, i32
  }
  func.func @transform_5(%arg0: i32) -> (i32, i32) {
    %c0_i32 = arith.constant 0 : i32
    %c0_i32_0 = arith.constant 0 : i32
    %c0_i32_1 = arith.constant 0 : i32
    return %c0_i32, %c0_i32_0 : i32, i32
  }
  func.func @transform_6(%arg0: i32) -> (i32, i32) {
    %c0_i32 = arith.constant 0 : i32
    %c0_i32_0 = arith.constant 0 : i32
    %c0_i32_1 = arith.constant 0 : i32
    return %c0_i32, %c0_i32_0 : i32, i32
  }
  func.func @transform_7(%arg0: i32) -> (i32, i32) {
    %c0_i32 = arith.constant 0 : i32
    %c0_i32_0 = arith.constant 0 : i32
    return %c0_i32, %arg0 : i32, i32
  }
}

</mosaic_0001>

<bundles_post_ra>
// kernel: tpu_custom_call.1
= control target key start
LH: loop header
LB: loop body
LE: loop exit
PB: predicated region body
PF: predicated region fallthrough
CT: control target
= control target key end

     0   :  { %s2619_s0 = inlined_call_operand.vmem [shape: f32[1000,11], index: 0, kind: input, shape index: {}]   ;;  %s2620_s1 = inlined_call_operand.vmem [shape: f32[10,11], index: 1, kind: input, shape index: {}]   ;;  %s2621_s2 = inlined_call_operand.vmem [shape: f32[10,1], index: 2, kind: input, shape index: {}]   ;;  %s2622_s3 = inlined_call_operand.vmem [shape: f32[8,10], index: 3, kind: input, shape index: {}]   ;;  %s2623_s4 = inlined_call_operand.vmem [shape: f32[8,1], index: 4, kind: input, shape index: {}]   ;;  %s2624_s5 = inlined_call_operand.vmem [shape: f32[1,8], index: 5, kind: input, shape index: {}]   ;;  %s2625_s6 = inlined_call_operand.<no memory space> [shape: f32[1,1], index: 6, kind: input, shape index: {}]   ;;  %s2626_s7 = inlined_call_operand.hbm [shape: f32[1,1000], index: 7, kind: output, shape index: {}]  }
   0x1   :  { %v12_v0 = vstv %s2625_s6 }
   0x2   :  { %13 = vst [vmem:[#allocation2] sm:$0x1] %v12_v0 }
   0x3   :  { %v60_v1 = vld [vmem:[%s2619_s0 + $0xf8] sm:$0xff]  ;;  %vm168_vm0 = vcmask 89088   ;;  %v59_v5 = vld [vmem:[%s2619_s0 + $0xf0] sm:$0xff]  ;;  %v58_v9 = vld [vmem:[%s2619_s0 + $0xe8] sm:$0xff]  ;;  %v1935_v11 = vmov 0  }
   0x4   :  { %v92_v2 = vld [vmem:[%s2619_s0 + $0x1f8] sm:$0xff]  ;;  %1767 = vmatprep.subr.msk.mxu0 %vm168_vm0, %v60_v1  ;;  %v91_v6 = vld [vmem:[%s2619_s0 + $0x1f0] sm:$0xff]  ;;  %v90_v10 = vld [vmem:[%s2619_s0 + $0x1e8] sm:$0xff]  ;;  %1879 = vset.pattern.permute.xlu0 %v1935_v11 }
   0x5   :  { %v44_v3 = vld [vmem:[%s2619_s0 + $0x78] sm:$0xff]  ;;  %1803 = vmatprep.subr.msk.mxu1 %vm168_vm0, %v92_v2  ;;  %v43_v7 = vld [vmem:[%s2619_s0 + $0x70] sm:$0xff]  ;;  %1880 = vset.pattern.permute.xlu1 %v1935_v11  ;;  %v42_v12 = vld [vmem:[%s2619_s0 + $0x68] sm:$0xff] }
   0x6   :  { %v76_v4 = vld [vmem:[%s2619_s0 + $0x178] sm:$0xff]  ;;  %1768 = vmatpush3.xpose.msk.msra.mxu0 %vm168_vm0, %v44_v3  ;;  %v75_v8 = vld [vmem:[%s2619_s0 + $0x170] sm:$0xff]  ;;  %v74_v13 = vld [vmem:[%s2619_s0 + $0x168] sm:$0xff] }
   0x7   :  { %1804 = vmatpush3.xpose.msk.msra.mxu1 %vm168_vm0, %v76_v4  ;;  %1769 = vmatprep.subr.msk.mxu0 %vm168_vm0, %v59_v5  ;;  %v57_v14 = vld [vmem:[%s2619_s0 + $0xe0] sm:$0xff]  ;;  %v56_v18 = vld [vmem:[%s2619_s0 + $0xd8] sm:$0xff]  ;;  %v55_v22 = vld [vmem:[%s2619_s0 + $0xd0] sm:$0xff] }
   0x8   :  { %1805 = vmatprep.subr.msk.mxu1 %vm168_vm0, %v91_v6  ;;  %v89_v15 = vld [vmem:[%s2619_s0 + $0x1e0] sm:$0xff]  ;;  %v88_v19 = vld [vmem:[%s2619_s0 + $0x1d8] sm:$0xff]  ;;  %v87_v23 = vld [vmem:[%s2619_s0 + $0x1d0] sm:$0xff] }
   0x9   :  { %v41_v16 = vld [vmem:[%s2619_s0 + $0x60] sm:$0xff]  ;;  %v40_v20 = vld [vmem:[%s2619_s0 + $0x58] sm:$0xff]  ;;  %v39_v24 = vld [vmem:[%s2619_s0 + $0x50] sm:$0xff] }
   0xa   :  { %1770 = vmatpush3.xpose.msk.msra.mxu0 %vm168_vm0, %v43_v7  ;;  %v73_v17 = vld [vmem:[%s2619_s0 + $0x160] sm:$0xff]  ;;  %v72_v21 = vld [vmem:[%s2619_s0 + $0x158] sm:$0xff]  ;;  %v71_v25 = vld [vmem:[%s2619_s0 + $0x150] sm:$0xff] }
   0xb   :  { %1806 = vmatpush3.xpose.msk.msra.mxu1 %vm168_vm0, %v75_v8  ;;  %1771 = vmatprep.subr.msk.mxu0 %vm168_vm0, %v58_v9  ;;  %v54_v26 = vld [vmem:[%s2619_s0 + $0xc8] sm:$0xff]  ;;  %v2085_v28 = vld [vmem:[%s2620_s1] sm:$0xff]  ;;  %v52_v35 = vld [vmem:[%s2619_s0 + $0xb8] sm:$0xff] }
   0xc   :  { %1807 = vmatprep.subr.msk.mxu1 %vm168_vm0, %v90_v10  ;;  %v86_v27 = vld [vmem:[%s2619_s0 + $0x1c8] sm:$0xff]  ;;  %v53_v31 = vld [vmem:[%s2619_s0 + $0xc0] sm:$0xff]  ;;  %1799 = vmatprep.mubr.msk.f32.mxu0 %vm168_vm0, %v2085_v28  ;;  %v84_v36 = vld [vmem:[%s2619_s0 + $0x1b8] sm:$0xff] }
   0xd   :  { %v38_v29 = vld [vmem:[%s2619_s0 + $0x48] sm:$0xff]  ;;  %v85_v32 = vld [vmem:[%s2619_s0 + $0x1c0] sm:$0xff]  ;;  %1835 = vmatprep.mubr.msk.f32.mxu1 %vm168_vm0, %v2085_v28  ;;  %v36_v37 = vld [vmem:[%s2619_s0 + $0x38] sm:$0xff] }
   0xe   :  { %1772 = vmatpush3.xpose.msk.msra.mxu0 %vm168_vm0, %v42_v12  ;;  %v70_v30 = vld [vmem:[%s2619_s0 + $0x148] sm:$0xff]  ;;  %v37_v33 = vld [vmem:[%s2619_s0 + $0x40] sm:$0xff]  ;;  %v68_v38 = vld [vmem:[%s2619_s0 + $0x138] sm:$0xff] }
   0xf   :  { %1808 = vmatpush3.xpose.msk.msra.mxu1 %vm168_vm0, %v74_v13  ;;  %1773 = vmatprep.subr.msk.mxu0 %vm168_vm0, %v57_v14  ;;  %v69_v34 = vld [vmem:[%s2619_s0 + $0x140] sm:$0xff]  ;;  %v51_v39 = vld [vmem:[%s2619_s0 + $0xb0] sm:$0xff]  ;;  %v50_v43 = vld [vmem:[%s2619_s0 + $0xa8] sm:$0xff] }
  0x10   :  { %1809 = vmatprep.subr.msk.mxu1 %vm168_vm0, %v89_v15  ;;  %v83_v40 = vld [vmem:[%s2619_s0 + $0x1b0] sm:$0xff]  ;;  %v82_v44 = vld [vmem:[%s2619_s0 + $0x1a8] sm:$0xff]  ;;  %v49_v48 = vld [vmem:[%s2619_s0 + $0xa0] sm:$0xff] }
  0x11   :  { %v35_v41 = vld [vmem:[%s2619_s0 + $0x30] sm:$0xff]  ;;  %v157_v45 = vld [vmem:[%s2621_s2 + $0x8] sm:$0x3]  ;;  %v81_v49 = vld [vmem:[%s2619_s0 + $0x1a0] sm:$0xff] }
  0x12   :  { %1774 = vmatpush3.xpose.msk.msra.mxu0 %vm168_vm0, %v41_v16  ;;  %v67_v42 = vld [vmem:[%s2619_s0 + $0x130] sm:$0xff]  ;;  %v34_v46 = vld [vmem:[%s2619_s0 + $0x28] sm:$0xff]  ;;  %165 = vperm.xlu0 %1879, %v157_v45   ;;  %v156_v50 = vld [vmem:[%s2621_s2] sm:$0xff] }
  0x13   :  { %1810 = vmatpush3.xpose.msk.msra.mxu1 %vm168_vm0, %v73_v17  ;;  %1775 = vmatprep.subr.msk.mxu0 %vm168_vm0, %v56_v18  ;;  %v66_v47 = vld [vmem:[%s2619_s0 + $0x128] sm:$0xff] }
  0x14   :  { %1811 = vmatprep.subr.msk.mxu1 %vm168_vm0, %v88_v19 }
  0x16   :  { %1776 = vmatpush3.xpose.msk.msra.mxu0 %vm168_vm0, %v40_v20 }
  0x17   :  { %1812 = vmatpush3.xpose.msk.msra.mxu1 %vm168_vm0, %v72_v21  ;;  %1777 = vmatprep.subr.msk.mxu0 %vm168_vm0, %v55_v22 }
  0x18   :  { %1813 = vmatprep.subr.msk.mxu1 %vm168_vm0, %v87_v23 }
  0x1a   :  { %1778 = vmatpush3.xpose.msk.msra.mxu0 %vm168_vm0, %v39_v24 }
  0x1b   :  { %1814 = vmatpush3.xpose.msk.msra.mxu1 %vm168_vm0, %v71_v25  ;;  %1779 = vmatprep.subr.msk.mxu0 %vm168_vm0, %v54_v26 }
  0x1c   :  { %1815 = vmatprep.subr.msk.mxu1 %vm168_vm0, %v86_v27 }
  0x1e   :  { %1780 = vmatpush3.xpose.msk.msra.mxu0 %vm168_vm0, %v38_v29 }
  0x1f   :  { %1816 = vmatpush3.xpose.msk.msra.mxu1 %vm168_vm0, %v70_v30  ;;  %1781 = vmatprep.subr.msk.mxu0 %vm168_vm0, %v53_v31 }
  0x20   :  { %1817 = vmatprep.subr.msk.mxu1 %vm168_vm0, %v85_v32 }
  0x22   :  { %1782 = vmatpush3.xpose.msk.msra.mxu0 %vm168_vm0, %v37_v33 }
  0x23   :  { %1818 = vmatpush3.xpose.msk.msra.mxu1 %vm168_vm0, %v69_v34  ;;  %1783 = vmatprep.subr.msk.mxu0 %vm168_vm0, %v52_v35 }
  0x24   :  { %1819 = vmatprep.subr.msk.mxu1 %vm168_vm0, %v84_v36 }
  0x26   :  { %1784 = vmatpush3.xpose.msk.msra.mxu0 %vm168_vm0, %v36_v37 }
  0x27   :  { %1820 = vmatpush3.xpose.msk.msra.mxu1 %vm168_vm0, %v68_v38  ;;  %1785 = vmatprep.subr.msk.mxu0 %vm168_vm0, %v51_v39 }
  0x28   :  { %1821 = vmatprep.subr.msk.mxu1 %vm168_vm0, %v83_v40 }
  0x2a   :  { %1786 = vmatpush3.xpose.msk.msra.mxu0 %vm168_vm0, %v35_v41 }
  0x2b   :  { %1822 = vmatpush3.xpose.msk.msra.mxu1 %vm168_vm0, %v67_v42  ;;  %1787 = vmatprep.subr.msk.mxu0 %vm168_vm0, %v50_v43 }
  0x2c   :  { %1823 = vmatprep.subr.msk.mxu1 %vm168_vm0, %v82_v44 }
  0x2e   :  { %1788 = vmatpush3.xpose.msk.msra.mxu0 %vm168_vm0, %v34_v46 }
  0x2f   :  { %1824 = vmatpush3.xpose.msk.msra.mxu1 %vm168_vm0, %v66_v47 }
  0x30   :  { %14 = vsyncpa [#allocation4], 0  ;;  %1789 = vmatprep.subr.msk.mxu0 %vm168_vm0, %v49_v48  ;;  %1825 = vmatprep.subr.msk.mxu1 %vm168_vm0, %v81_v49  ;;  %v33_v51 = vld [vmem:[%s2619_s0 + $0x20] sm:$0xff]  ;;  %v48_v53 = vld [vmem:[%s2619_s0 + $0x98] sm:$0xff]  ;;  %v1936_v6 = vmov 0.0   ;;  %vm885_vm1 = vcmask 1041408  }
  0x31   :  { %v65_v52 = vld [vmem:[%s2619_s0 + $0x120] sm:$0xff]  ;;  %v80_v54 = vld [vmem:[%s2619_s0 + $0x198] sm:$0xff]  ;;  %160 = vperm.xlu0 %1879, %v156_v50   ;;  %v47_v57 = vld [vmem:[%s2619_s0 + $0x90] sm:$0xff]  ;;  %vm881_vm2 = vcmask 80896   ;;  %vm1213_vm3 = vcmask 64512  }
  0x32   :  { %1790 = vmatpush3.xpose.msk.msra.mxu0 %vm168_vm0, %v33_v51  ;;  %v32_v55 = vld [vmem:[%s2619_s0 + $0x18] sm:$0xff]  ;;  %v79_v58 = vld [vmem:[%s2619_s0 + $0x190] sm:$0xff]  ;;  %v46_v61 = vld [vmem:[%s2619_s0 + $0x88] sm:$0xff] }
  0x33   :  { %1826 = vmatpush3.xpose.msk.msra.mxu1 %vm168_vm0, %v65_v52  ;;  %1791 = vmatprep.subr.msk.mxu0 %vm168_vm0, %v48_v53  ;;  %v64_v56 = vld [vmem:[%s2619_s0 + $0x118] sm:$0xff]  ;;  %v31_v59 = vld [vmem:[%s2619_s0 + $0x10] sm:$0xff]  ;;  %v78_v62 = vld [vmem:[%s2619_s0 + $0x188] sm:$0xff] }
  0x34   :  { %1827 = vmatprep.subr.msk.mxu1 %vm168_vm0, %v80_v54  ;;  %v63_v60 = vld [vmem:[%s2619_s0 + $0x110] sm:$0xff]  ;;  %v30_v63 = vld [vmem:[%s2619_s0 + $0x8] sm:$0xff]  ;;  %v45_v1 = vld [vmem:[%s2619_s0 + $0x80] sm:$0xff] }
  0x35   :  { %v62_v0 = vld [vmem:[%s2619_s0 + $0x108] sm:$0xff]  ;;  %v77_v2 = vld [vmem:[%s2619_s0 + $0x180] sm:$0xff]  ;;  %v124_v5 = vld [vmem:[%s2619_s0 + $0x2f8] sm:$0xff] }
  0x36   :  { %1792 = vmatpush3.xpose.msk.msra.mxu0 %vm168_vm0, %v32_v55  ;;  %v29_v3 = vld [vmem:[%s2619_s0] sm:$0xff]  ;;  %v108_v7 = vld [vmem:[%s2619_s0 + $0x278] sm:$0xff]  ;;  %v2267_v9 = vld [vmem:[%s2620_s1 + $0x8] sm:$0x3] }
  0x37   :  { %1828 = vmatpush3.xpose.msk.msra.mxu1 %vm168_vm0, %v64_v56  ;;  %1793 = vmatprep.subr.msk.mxu0 %vm168_vm0, %v47_v57  ;;  %v61_v4 = vld [vmem:[%s2619_s0 + $0x100] sm:$0xff]  ;;  %v140_v8 = vld [vmem:[%s2619_s0 + $0x378] sm:$0xff]  ;;  %v123_v10 = vld [vmem:[%s2619_s0 + $0x2f0] sm:$0xff] }
  0x38   :  { %1829 = vmatprep.subr.msk.mxu1 %vm168_vm0, %v79_v58  ;;  %v107_v11 = vld [vmem:[%s2619_s0 + $0x270] sm:$0xff]  ;;  %v122_v13 = vld [vmem:[%s2619_s0 + $0x2e8] sm:$0xff]  ;;  %v121_v16 = vld [vmem:[%s2619_s0 + $0x2e0] sm:$0xff] }
  0x39   :  { %v139_v12 = vld [vmem:[%s2619_s0 + $0x370] sm:$0xff]  ;;  %v106_v14 = vld [vmem:[%s2619_s0 + $0x268] sm:$0xff]  ;;  %v105_v17 = vld [vmem:[%s2619_s0 + $0x260] sm:$0xff] }
  0x3a   :  { %1794 = vmatpush3.xpose.msk.msra.mxu0 %vm168_vm0, %v31_v59  ;;  %v138_v15 = vld [vmem:[%s2619_s0 + $0x368] sm:$0xff]  ;;  %v137_v18 = vld [vmem:[%s2619_s0 + $0x360] sm:$0xff]  ;;  %v120_v19 = vld [vmem:[%s2619_s0 + $0x2d8] sm:$0xff] }
  0x3b   :  { %1830 = vmatpush3.xpose.msk.msra.mxu1 %vm168_vm0, %v63_v60  ;;  %1795 = vmatprep.subr.msk.mxu0 %vm168_vm0, %v46_v61  ;;  %v104_v20 = vld [vmem:[%s2619_s0 + $0x258] sm:$0xff]  ;;  %v119_v22 = vld [vmem:[%s2619_s0 + $0x2d0] sm:$0xff]  ;;  %v118_v25 = vld [vmem:[%s2619_s0 + $0x2c8] sm:$0xff] }
  0x3c   :  { %1831 = vmatprep.subr.msk.mxu1 %vm168_vm0, %v78_v62  ;;  %v136_v21 = vld [vmem:[%s2619_s0 + $0x358] sm:$0xff]  ;;  %v103_v23 = vld [vmem:[%s2619_s0 + $0x250] sm:$0xff]  ;;  %v102_v26 = vld [vmem:[%s2619_s0 + $0x248] sm:$0xff] }
  0x3d   :  { %v135_v24 = vld [vmem:[%s2619_s0 + $0x350] sm:$0xff]  ;;  %v134_v27 = vld [vmem:[%s2619_s0 + $0x348] sm:$0xff]  ;;  %v117_v29 = vld [vmem:[%s2619_s0 + $0x2c0] sm:$0xff] }
  0x3e   :  { %1796 = vmatpush3.xpose.msk.msra.mxu0 %vm168_vm0, %v30_v63  ;;  %v101_v30 = vld [vmem:[%s2619_s0 + $0x240] sm:$0xff]  ;;  %v116_v32 = vld [vmem:[%s2619_s0 + $0x2b8] sm:$0xff]  ;;  %v115_v35 = vld [vmem:[%s2619_s0 + $0x2b0] sm:$0xff] }
  0x3f   :  { %1832 = vmatpush3.xpose.msk.msra.mxu1 %vm168_vm0, %v62_v0  ;;  %1797 = vmatprep.subr.msk.mxu0 %vm168_vm0, %v45_v1  ;;  %v133_v31 = vld [vmem:[%s2619_s0 + $0x340] sm:$0xff]  ;;  %v100_v33 = vld [vmem:[%s2619_s0 + $0x238] sm:$0xff]  ;;  %v99_v36 = vld [vmem:[%s2619_s0 + $0x230] sm:$0xff] }
  0x40   :  { %1833 = vmatprep.subr.msk.mxu1 %vm168_vm0, %v77_v2  ;;  %v132_v34 = vld [vmem:[%s2619_s0 + $0x338] sm:$0xff]  ;;  %v131_v37 = vld [vmem:[%s2619_s0 + $0x330] sm:$0xff]  ;;  %v114_v38 = vld [vmem:[%s2619_s0 + $0x2a8] sm:$0xff] }
  0x41   :  { %v98_v39 = vld [vmem:[%s2619_s0 + $0x228] sm:$0xff]  ;;  %v113_v41 = vld [vmem:[%s2619_s0 + $0x2a0] sm:$0xff]  ;;  %v112_v44 = vld [vmem:[%s2619_s0 + $0x298] sm:$0xff] }
  0x42   :  { %1798 = vmatpush3.xpose.msk.msra.mxu0 %vm168_vm0, %v29_v3  ;;  %v130_v40 = vld [vmem:[%s2619_s0 + $0x328] sm:$0xff]  ;;  %v97_v42 = vld [vmem:[%s2619_s0 + $0x220] sm:$0xff]  ;;  %v96_v45 = vld [vmem:[%s2619_s0 + $0x218] sm:$0xff] }
  0x43   :  { %1834 = vmatpush3.xpose.msk.msra.mxu1 %vm168_vm0, %v61_v4  ;;  %1839 = vmatprep.subr.msk.mxu0 %vm168_vm0, %v124_v5  ;;  %v129_v43 = vld [vmem:[%s2619_s0 + $0x320] sm:$0xff]  ;;  %v128_v46 = vld [vmem:[%s2619_s0 + $0x318] sm:$0xff]  ;;  %v111_v47 = vld [vmem:[%s2619_s0 + $0x290] sm:$0xff] }
  0x44   :  { %781 = vmatprep.subr.mxu1 %v1936_v6  ;;  %v95_v48 = vld [vmem:[%s2619_s0 + $0x210] sm:$0xff]  ;;  %v110_v50 = vld [vmem:[%s2619_s0 + $0x288] sm:$0xff]  ;;  %v109_v53 = vld [vmem:[%s2619_s0 + $0x280] sm:$0xff] }
  0x45   :  { %1800 = vmatmul.mubr.msk.f32.vlgmr.msra.gmra.mxu0 %vm168_vm0, %v2085_v28  ;;  %v127_v49 = vld [vmem:[%s2619_s0 + $0x310] sm:$0xff]  ;;  %v94_v51 = vld [vmem:[%s2619_s0 + $0x208] sm:$0xff]  ;;  %v93_v54 = vld [vmem:[%s2619_s0 + $0x200] sm:$0xff] }
  0x46   :  { %1836 = vmatmul.mubr.msk.f32.vlgmr.msra.gmra.mxu1 %vm168_vm0, %v2085_v28  ;;  %1840 = vmatpush3.xpose.msk.msra.mxu0 %vm168_vm0, %v108_v7  ;;  %v126_v52 = vld [vmem:[%s2619_s0 + $0x308] sm:$0xff]  ;;  %v125_v55 = vld [vmem:[%s2619_s0 + $0x300] sm:$0xff]  ;;  %v152_v57 = vld [vmem:[%s2619_s0 + $0x3d8] sm:$0xff] }
  0x47   :  { %1720 = vmatpush1.xpose.msk.msra.mxu1 %vm168_vm0, %v140_v8  ;;  %1801 = vmatprep.mubr.msk.f32.mxu0 %vm168_vm0, %v2267_v9  ;;  %v153_v56 = vld [vmem:[%s2619_s0 + $0x3e0] sm:$0xff]  ;;  %v151_v58 = vld [vmem:[%s2619_s0 + $0x3d0] sm:$0xff]  ;;  %v150_v59 = vld [vmem:[%s2619_s0 + $0x3c8] sm:$0xff] }
  0x48   :  { %1841 = vmatprep.subr.msk.mxu0 %vm168_vm0, %v123_v10  ;;  %783 = vmatprep.subr.mxu1 %v1936_v6  ;;  %v149_v60 = vld [vmem:[%s2619_s0 + $0x3c0] sm:$0xff]  ;;  %v148_v61 = vld [vmem:[%s2619_s0 + $0x3b8] sm:$0xff]  ;;  %v147_v62 = vld [vmem:[%s2619_s0 + $0x3b0] sm:$0xff] }
  0x49   :  { %1837 = vmatprep.mubr.msk.f32.mxu1 %vm168_vm0, %v2267_v9  ;;  %1802 = vmatmul.mubr.msk.f32.gmra.mxu0 %vm168_vm0, %v2267_v9  ;;  %v146_v63 = vld [vmem:[%s2619_s0 + $0x3a8] sm:$0xff]  ;;  %v145_v0 = vld [vmem:[%s2619_s0 + $0x3a0] sm:$0xff]  ;;  %v144_v1 = vld [vmem:[%s2619_s0 + $0x398] sm:$0xff] }
  0x4a   :  { %1838 = vmatmul.mubr.msk.f32.gmra.mxu1 %vm168_vm0, %v2267_v9  ;;  %1842 = vmatpush3.xpose.msk.msra.mxu0 %vm168_vm0, %v107_v11  ;;  %v143_v2 = vld [vmem:[%s2619_s0 + $0x390] sm:$0xff]  ;;  %v142_v3 = vld [vmem:[%s2619_s0 + $0x388] sm:$0xff]  ;;  %v141_v4 = vld [vmem:[%s2619_s0 + $0x380] sm:$0xff] }
  0x4b   :  { %1721 = vmatpush1.xpose.msk.msra.mxu1 %vm168_vm0, %v139_v12  ;;  %1843 = vmatprep.subr.msk.mxu0 %vm168_vm0, %v122_v13  ;;  %v875_v5 = vld [vmem:[%s2623_s4] sm:$0xff] }
  0x4c   :  { %785 = vmatprep.subr.mxu1 %v1936_v6  ;;  %1871 = vmatprep.mubr.msk.f32.mxu0 %vm168_vm0, %v2085_v28 }
  0x4d   :  { %845 = vmatprep.mubr.f32.mxu1 %v1936_v6  ;;  %878 = vperm.xlu1 %1880, %v875_v5   ;;  %v1202_v5 = vld [vmem:[%s2624_s5] sm:$0x1]  ;;  %s1938_s5 = smov [#allocation3]  }
  0x4e   :  { %1844 = vmatpush3.xpose.msk.msra.mxu0 %vm168_vm0, %v106_v14  ;;  %v1203_v14 = vld [vmem:[#allocation2] sm:$0x1]  ;;  %s1610_s11 = sshll.u32 %s1938_s5, 4  ;;  %s1611_s11 = int_to_ptr.vmem [resolvable:$true] %s1610_s11 }
  0x4f   :  { %1722 = vmatpush1.xpose.msk.msra.mxu1 %vm168_vm0, %v138_v15  ;;  %1845 = vmatprep.subr.msk.mxu0 %vm168_vm0, %v121_v16  ;;  %s1913_s12 = scalar_lea.vmem %s1611_s11, 128  ;;  %p1918_p1 = scmp.lt.s32.totalorder %s1611_s11, %s1611_s11 }
  0x50   :  { %787 = vmatprep.subr.mxu1 %v1936_v6  ;;  %p1914_p0 = scmp.ne.s32.totalorder %s1611_s11, %s1913_s12  ;;  %p1919_p2 = scmp.lt.s32.totalorder %s1913_s12, %s1913_s12 }
  0x51   :  { %1206 = vperm.xlu1 %1880, %v1203_v14  }
  0x52   :  { %1846 = vmatpush3.xpose.msk.msra.mxu0 %vm168_vm0, %v105_v17  ;;  %p1920_p3 = por %p1919_p2, %p1918_p1 }
  0x53   :  { %1723 = vmatpush1.xpose.msk.msra.mxu1 %vm168_vm0, %v137_v18  ;;  %1847 = vmatprep.subr.msk.mxu0 %vm168_vm0, %v120_v19 }
  0x54   :  { %789 = vmatprep.subr.mxu1 %v1936_v6  ;;  %p1921_p4 = pnand %p1920_p3, %p1914_p0 }
  0x56   :  { %1848 = vmatpush3.xpose.msk.msra.mxu0 %vm168_vm0, %v104_v20 }
  0x57   :  { %1724 = vmatpush1.xpose.msk.msra.mxu1 %vm168_vm0, %v136_v21  ;;  %1849 = vmatprep.subr.msk.mxu0 %vm168_vm0, %v119_v22 }
  0x58   :  { %791 = vmatprep.subr.mxu1 %v1936_v6 }
  0x5a   :  { %1850 = vmatpush3.xpose.msk.msra.mxu0 %vm168_vm0, %v103_v23 }
  0x5b   :  { %1725 = vmatpush1.xpose.msk.msra.mxu1 %vm168_vm0, %v135_v24  ;;  %1851 = vmatprep.subr.msk.mxu0 %vm168_vm0, %v118_v25 }
  0x5c   :  { %793 = vmatprep.subr.mxu1 %v1936_v6 }
  0x5e   :  { %1852 = vmatpush3.xpose.msk.msra.mxu0 %vm168_vm0, %v102_v26 }
  0x5f   :  { %1726 = vmatpush1.xpose.msk.msra.mxu1 %vm168_vm0, %v134_v27  ;;  %1853 = vmatprep.subr.msk.mxu0 %vm168_vm0, %v117_v29 }
  0x60   :  { %795 = vmatprep.subr.mxu1 %v1936_v6 }
  0x62   :  { %1854 = vmatpush3.xpose.msk.msra.mxu0 %vm168_vm0, %v101_v30 }
  0x63   :  { %1727 = vmatpush1.xpose.msk.msra.mxu1 %vm168_vm0, %v133_v31  ;;  %1855 = vmatprep.subr.msk.mxu0 %vm168_vm0, %v116_v32  ;;  %v874_v31 = vld [vmem:[%s2622_s3] sm:$0xff] }
  0x64   :  { %797 = vmatprep.subr.mxu1 %v1936_v6 }
  0x66   :  { %1856 = vmatpush3.xpose.msk.msra.mxu0 %vm168_vm0, %v100_v33 }
  0x67   :  { %1728 = vmatpush1.xpose.msk.msra.mxu1 %vm168_vm0, %v132_v34  ;;  %1857 = vmatprep.subr.msk.mxu0 %vm168_vm0, %v115_v35 }
  0x68   :  { %799 = vmatprep.subr.mxu1 %v1936_v6 }
  0x6a   :  { %1858 = vmatpush3.xpose.msk.msra.mxu0 %vm168_vm0, %v99_v36 }
  0x6b   :  { %1729 = vmatpush1.xpose.msk.msra.mxu1 %vm168_vm0, %v131_v37  ;;  %1859 = vmatprep.subr.msk.mxu0 %vm168_vm0, %v114_v38 }
  0x6c   :  { %801 = vmatprep.subr.mxu1 %v1936_v6 }
  0x6e   :  { %1860 = vmatpush3.xpose.msk.msra.mxu0 %vm168_vm0, %v98_v39 }
  0x6f   :  { %1730 = vmatpush1.xpose.msk.msra.mxu1 %vm168_vm0, %v130_v40  ;;  %1861 = vmatprep.subr.msk.mxu0 %vm168_vm0, %v113_v41 }
  0x70   :  { %803 = vmatprep.subr.mxu1 %v1936_v6 }
  0x72   :  { %1862 = vmatpush3.xpose.msk.msra.mxu0 %vm168_vm0, %v97_v42 }
  0x73   :  { %1731 = vmatpush1.xpose.msk.msra.mxu1 %vm168_vm0, %v129_v43  ;;  %1863 = vmatprep.subr.msk.mxu0 %vm168_vm0, %v112_v44 }
  0x74   :  { %805 = vmatprep.subr.mxu1 %v1936_v6 }
  0x76   :  { %1864 = vmatpush3.xpose.msk.msra.mxu0 %vm168_vm0, %v96_v45 }
  0x77   :  { %1732 = vmatpush1.xpose.msk.msra.mxu1 %vm168_vm0, %v128_v46  ;;  %1865 = vmatprep.subr.msk.mxu0 %vm168_vm0, %v111_v47 }
  0x78   :  { %807 = vmatprep.subr.mxu1 %v1936_v6 }
  0x7a   :  { %1866 = vmatpush3.xpose.msk.msra.mxu0 %vm168_vm0, %v95_v48 }
  0x7b   :  { %1733 = vmatpush1.xpose.msk.msra.mxu1 %vm168_vm0, %v127_v49  ;;  %1867 = vmatprep.subr.msk.mxu0 %vm168_vm0, %v110_v50 }
  0x7c   :  { %809 = vmatprep.subr.mxu1 %v1936_v6 }
  0x7e   :  { %1868 = vmatpush3.xpose.msk.msra.mxu0 %vm168_vm0, %v94_v51 }
  0x7f   :  { %1734 = vmatpush1.xpose.msk.msra.mxu1 %vm168_vm0, %v126_v52  ;;  %1869 = vmatprep.subr.msk.mxu0 %vm168_vm0, %v109_v53 }
  0x80   :  { %811 = vmatprep.subr.mxu1 %v1936_v6 }
  0x82   :  { %1870 = vmatpush3.xpose.msk.msra.mxu0 %vm168_vm0, %v93_v54 }
  0x83   :  { %1735 = vmatpush1.xpose.msk.msra.mxu1 %vm168_vm0, %v125_v55 }
  0x84   :  { %819 = vmatprep.subr.mxu1 %v1936_v6 }
  0x85   :  { %1872 = vmatmul.mubr.msk.f32.vlgmr.msra.gmra.mxu0 %vm168_vm0, %v2085_v28 }
  0x86   :  { %1873 = vmatprep.mubr.msk.f32.mxu0 %vm168_vm0, %v2267_v9 }
  0x87   :  { %1736 = vmatpush2.xpose.msk.msra.mxu1 %vm168_vm0, %v153_v56 }
  0x88   :  { %821 = vmatprep.subr.mxu1 %v1936_v6 }
  0x89   :  { %1874 = vmatmul.mubr.msk.f32.gmra.mxu0 %vm168_vm0, %v2267_v9 }
  0x8a   :  { %974 = vmatprep.mubr.f32.mxu0 %v1936_v6 }
  0x8b   :  { %1737 = vmatpush2.xpose.msk.msra.mxu1 %vm168_vm0, %v152_v57 }
  0x8c   :  { %823 = vmatprep.subr.mxu1 %v1936_v6 }
  0x8d   :  { %v2561_v7 = vpop.permute.xlu0 %165 }
  0x8f   :  { %1738 = vmatpush2.xpose.msk.msra.mxu1 %vm168_vm0, %v151_v58 }
  0x90   :  { %825 = vmatprep.subr.mxu1 %v1936_v6 }
  0x93   :  { %1739 = vmatpush2.xpose.msk.msra.mxu1 %vm168_vm0, %v150_v59 }
  0x94   :  { %827 = vmatprep.subr.mxu1 %v1936_v6 }
  0x97   :  { %1740 = vmatpush2.xpose.msk.msra.mxu1 %vm168_vm0, %v149_v60 }
  0x98   :  { %829 = vmatprep.subr.mxu1 %v1936_v6 }
  0x9b   :  { %1741 = vmatpush2.xpose.msk.msra.mxu1 %vm168_vm0, %v148_v61 }
  0x9c   :  { %831 = vmatprep.subr.mxu1 %v1936_v6 }
  0x9f   :  { %1742 = vmatpush2.xpose.msk.msra.mxu1 %vm168_vm0, %v147_v62 }
  0xa0   :  { %833 = vmatprep.subr.mxu1 %v1936_v6 }
  0xa3   :  { %1743 = vmatpush2.xpose.msk.msra.mxu1 %vm168_vm0, %v146_v63 }
  0xa4   :  { %835 = vmatprep.subr.mxu1 %v1936_v6 }
  0xa7   :  { %1744 = vmatpush2.xpose.msk.msra.mxu1 %vm168_vm0, %v145_v0 }
  0xa8   :  { %837 = vmatprep.subr.mxu1 %v1936_v6 }
  0xab   :  { %1745 = vmatpush2.xpose.msk.msra.mxu1 %vm168_vm0, %v144_v1 }
  0xac   :  { %839 = vmatprep.subr.mxu1 %v1936_v6  ;;  %v2563_v13 = vpop.permute.xlu0 %160 }
  0xaf   :  { %1746 = vmatpush2.xpose.msk.msra.mxu1 %vm168_vm0, %v143_v2 }
  0xb0   :  { %841 = vmatprep.subr.mxu1 %v1936_v6 }
  0xb3   :  { %1747 = vmatpush2.xpose.msk.msra.mxu1 %vm168_vm0, %v142_v3 }
  0xb4   :  { %843 = vmatprep.subr.mxu1 %v1936_v6 }
  0xb7   :  { %1748 = vmatpush2.xpose.msk.msra.mxu1 %vm168_vm0, %v141_v4 }
  0xba   :  { %1749 = vmatmul.mubr.msk.f32.vlgmr.msra.gmra.mxu1 %vm168_vm0, %v2085_v28 }
  0xbb   :  { %851 = vmatprep.mubr.f32.mxu1 %v1936_v6 }
  0xbe   :  { %1750 = vmatmul.mubr.msk.f32.gmra.mxu1 %vm168_vm0, %v2267_v9 }
  0xc8   :  { %v879_v59 = vpop.permute.xlu1 %878 }
 0x105   :  { %v616_v8 = vpop.f32.mrf.mxu0 }
 0x106   :  { %v693_v10 = vpop.f32.mrf.mxu1  ;;  %v617_v19 = vadd.f32 %v616_v8, %v2563_v13 }
 0x107   :  { %v618_v11 = vpop.f32.mrf.mxu0  ;;  %v694_v32 = vadd.f32 %v693_v10, %v2563_v13 }
 0x108   :  { %v695_v12 = vpop.f32.mrf.mxu1  ;;  %v619_v16 = vadd.f32 %v618_v11, %v2563_v13  ;;  %v858_v26 = vmax.f32 %v617_v19, 0.0 }
 0x109   :  { %v622_v28 = vpop.f32.mrf.mxu0  ;;  %v696_v27 = vadd.f32 %v695_v12, %v2563_v13  ;;  %v860_v34 = vmax.f32 %v694_v32, 0.0 }
 0x10a   :  { %v699_v15 = vpop.f32.mrf.mxu1  ;;  %v623_v9 = vadd.f32 %v622_v28, %v2561_v7  ;;  %v859_v24 = vmax.f32 %v619_v16, 0.0 }
 0x10b   :  { %v624_v17 = vpop.f32.mrf.mxu0  ;;  %v700_v23 = vadd.f32 %v699_v15, %v2561_v7  ;;  %v861_v33 = vmax.f32 %v696_v27, 0.0 }
 0x10c   :  { %v701_v18 = vpop.f32.mrf.mxu1  ;;  %v625_v20 = vadd.f32 %v624_v17, %v2561_v7  ;;  %v866_v22 = vmax.f32 %v623_v9, 0.0 }
 0x10d   :  { %v702_v21 = vadd.f32 %v701_v18, %v2561_v7  ;;  %v868_v30 = vmax.f32 %v700_v23, 0.0 }
 0x10e   :  { %v867_v25 = vmax.f32 %v625_v20, 0.0 }
 0x10f   :  { %v869_v29 = vmax.f32 %v702_v21, 0.0 }
 0x110   :  { %1751 = vmatprep.subr.msk.mxu0 %vm885_vm1, %v867_v25 }
 0x111   :  { %1752 = vmatpush1.msk.msra.mxu0 %vm885_vm1, %v866_v22  ;;  %v1209_v22 = vlaneseq }
 0x112   :  { %940 = vmatprep.subr.mxu0 %v859_v24 }
 0x113   :  { %941 = vmatpush1.msra.mxu0 %v858_v26  ;;  %v2611_v24 = vshrl.u32 %v1209_v22, 7  ;;  %vm1601_vm4 = vcmp.lt.s32.totalorder %v1209_v22, 1000 }
 0x114   :  { %1753 = vmatmul.mubr.msk.f32.vlgmr.msra.gmra.mxu0 %vm881_vm2, %v874_v31  ;;  %1754 = vmatprep.subr.msk.mxu0 %vm885_vm1, %v869_v29 }
 0x115   :  { %1755 = vmatpush1.msk.msra.mxu0 %vm885_vm1, %v868_v30  ;;  %1045 = vmatprep.mubr.f32.mxu0 %v1936_v6  ;;  %v1211_v26 = vsub.s32 0, %v2611_v24 }
 0x116   :  { %1011 = vmatprep.subr.mxu0 %v861_v33 }
 0x117   :  { %1012 = vmatpush1.msra.mxu0 %v860_v34 }
 0x118   :  { %1756 = vmatmul.mubr.msk.f32.vlgmr.msra.gmra.mxu0 %vm881_vm2, %v874_v31 }
 0x119   :  { %1116 = vmatprep.mubr.f32.mxu0 %v1936_v6 }
 0x145   :  { %v770_v35 = vpop.f32.mrf.mxu0 }
 0x146   :  { %v771_v40 = vadd.f32 %v770_v35, %v2563_v13 }
 0x147   :  { %v772_v36 = vpop.f32.mrf.mxu0 }
 0x148   :  { %v773_v38 = vadd.f32 %v772_v36, %v2563_v13  ;;  %v862_v46 = vmax.f32 %v771_v40, 0.0 }
 0x149   :  { %v776_v37 = vpop.f32.mrf.mxu0 }
 0x14a   :  { %v777_v39 = vadd.f32 %v776_v37, %v2561_v7  ;;  %v863_v44 = vmax.f32 %v773_v38, 0.0 }
 0x14b   :  { %v778_v41 = vpop.f32.mrf.mxu0 }
 0x14c   :  { %v779_v42 = vadd.f32 %v778_v41, %v2561_v7  ;;  %v870_v43 = vmax.f32 %v777_v39, 0.0 }
 0x14e   :  { %v871_v45 = vmax.f32 %v779_v42, 0.0 }
 0x150   :  { %1757 = vmatprep.subr.msk.mxu0 %vm885_vm1, %v871_v45 }
 0x151   :  { %1758 = vmatpush1.msk.msra.mxu0 %vm885_vm1, %v870_v43 }
 0x152   :  { %1082 = vmatprep.subr.mxu0 %v863_v44 }
 0x153   :  { %1083 = vmatpush1.msra.mxu0 %v862_v46 }
 0x154   :  { %1759 = vmatmul.mubr.msk.f32.vlgmr.msra.gmra.mxu0 %vm881_vm2, %v874_v31 }
 0x155   :  { %1187 = vmatprep.mubr.f32.mxu0 %v1936_v6 }
 0x17a   :  { %v847_v47 = vpop.f32.mrf.mxu1 }
 0x17b   :  { %v848_v54 = vadd.f32 %v847_v47, %v2563_v13 }
 0x17c   :  { %v849_v48 = vpop.f32.mrf.mxu1 }
 0x17d   :  { %v850_v52 = vadd.f32 %v849_v48, %v2563_v13  ;;  %v864_v58 = vmax.f32 %v848_v54, 0.0 }
 0x17e   :  { %v853_v49 = vpop.f32.mrf.mxu1 }
 0x17f   :  { %v854_v50 = vadd.f32 %v853_v49, %v2561_v7  ;;  %v865_v57 = vmax.f32 %v850_v52, 0.0 }
 0x180   :  { %v855_v51 = vpop.f32.mrf.mxu1 }
 0x181   :  { %v856_v53 = vadd.f32 %v855_v51, %v2561_v7  ;;  %v872_v56 = vmax.f32 %v854_v50, 0.0 }
 0x183   :  { %v873_v55 = vmax.f32 %v856_v53, 0.0 }
 0x185   :  { %1760 = vmatprep.subr.msk.mxu0 %vm885_vm1, %v873_v55 }
 0x186   :  { %1761 = vmatpush1.msk.msra.mxu0 %vm885_vm1, %v872_v56 }
 0x187   :  { %1153 = vmatprep.subr.mxu0 %v865_v57 }
 0x188   :  { %1154 = vmatpush1.msra.mxu0 %v864_v58 }
 0x189   :  { %1762 = vmatmul.mubr.msk.f32.vlgmr.msra.gmra.mxu0 %vm881_vm2, %v874_v31 }
 0x18a   :  { %1281 = vmatprep.mubr.f32.mxu0 %v1936_v6 }
 0x1d4   :  { %v976_v60 = vpop.f32.mrf.mxu0 }
 0x1d5   :  { %v977_v61 = vadd.f32 %v976_v60, %v879_v59 }
 0x1d6   :  { %v978_v62 = vpop.f32.mrf.mxu0 }
 0x1d7   :  { %v979_v63 = vadd.f32 %v978_v62, %v879_v59  ;;  %v1194_v1 = vmax.f32 %v977_v61, 0.0 }
 0x1d8   :  { %v1047_v0 = vpop.f32.mrf.mxu0 }
 0x1d9   :  { %v1195_v2 = vmax.f32 %v979_v63, 0.0  ;;  %v1048_v3 = vadd.f32 %v1047_v0, %v879_v59 }
 0x1da   :  { %v1049_v4 = vpop.f32.mrf.mxu0 }
 0x1db   :  { %v1050_v7 = vadd.f32 %v1049_v4, %v879_v59  ;;  %1247 = vmatprep.subr.mxu0 %v1195_v2  ;;  %v1196_v8 = vmax.f32 %v1048_v3, 0.0 }
 0x1dc   :  { %1248 = vmatpush1.msra.mxu0 %v1194_v1 }
 0x1dd   :  { %v1197_v10 = vmax.f32 %v1050_v7, 0.0  ;;  %1763 = vmatmul.mubr.msk.f32.vlgmr.msra.gmra.mxu0 %vm1213_vm3, %v1202_v5 }
 0x1de   :  { %1352 = vmatprep.mubr.f32.mxu0 %v1936_v6 }
 0x1df   :  { %1318 = vmatprep.subr.mxu0 %v1197_v10 }
 0x1e0   :  { %1319 = vmatpush1.msra.mxu0 %v1196_v8 }
 0x1e1   :  { %1764 = vmatmul.mubr.msk.f32.vlgmr.msra.gmra.mxu0 %vm1213_vm3, %v1202_v5 }
 0x1e2   :  { %1423 = vmatprep.mubr.f32.mxu0 %v1936_v6 }
 0x214   :  { %v1118_v11 = vpop.f32.mrf.mxu0 }
 0x215   :  { %v1119_v12 = vadd.f32 %v1118_v11, %v879_v59 }
 0x216   :  { %v1120_v13 = vpop.f32.mrf.mxu0 }
 0x217   :  { %v1121_v14 = vadd.f32 %v1120_v13, %v879_v59  ;;  %v1198_v28 = vmax.f32 %v1119_v12, 0.0  ;;  %v1937_v12 = vmov 1966171168  }
 0x218   :  { %v1554_v13 = vunpack.c.l.s4 %v1937_v12 }
 0x219   :  { %v1199_v15 = vmax.f32 %v1121_v14, 0.0 }
 0x21b   :  { %1389 = vmatprep.subr.mxu0 %v1199_v15  ;;  %v1555_v15 = vunpack.c.0.s8 %v1554_v13 }
 0x21c   :  { %1390 = vmatpush1.msra.mxu0 %v1198_v28 }
 0x21d   :  { %1765 = vmatmul.mubr.msk.f32.vlgmr.msra.gmra.mxu0 %vm1213_vm3, %v1202_v5 }
 0x21e   :  { %1494 = vmatprep.mubr.f32.mxu0 %v1936_v6  ;;  %v1207_v6 = vpop.permute.xlu1 %1206 }
 0x21f   :  { %v1212_v30 = vrot.slane %v1207_v6, %v1211_v26 }
 0x249   :  { %v1189_v16 = vpop.f32.mrf.mxu0 }
 0x24a   :  { %v1190_v9 = vadd.f32 %v1189_v16, %v879_v59 }
 0x24b   :  { %v1191_v17 = vpop.f32.mrf.mxu0 }
 0x24c   :  { %v1192_v18 = vadd.f32 %v1191_v17, %v879_v59  ;;  %v1200_v20 = vmax.f32 %v1190_v9, 0.0 }
 0x24e   :  { %v1201_v19 = vmax.f32 %v1192_v18, 0.0 }
 0x250   :  { %1460 = vmatprep.subr.mxu0 %v1201_v19  ;;  %v1558_v19 = vsub.s32 %v1555_v15, %v2611_v24 }
 0x251   :  { %1461 = vmatpush1.msra.mxu0 %v1200_v20 }
 0x252   :  { %1766 = vmatmul.mubr.msk.f32.vlgmr.msra.gmra.mxu0 %vm1213_vm3, %v1202_v5 }
 0x29d   :  { %v1283_v21 = vpop.f32.mrf.mxu0 }
 0x29e   :  { %v1284_v35 = vadd.f32 %v1283_v21, %v1212_v30 }
 0x29f   :  { %v1285_v23 = vpop.f32.mrf.mxu0 }
 0x2a0   :  { %v1286_v32 = vadd.f32 %v1285_v23, %v1212_v30  ;;  %v1501_v41 = vsub.f32 0.0, %v1284_v35 }
 0x2a1   :  { %v1354_v25 = vpop.f32.mrf.mxu0 }
 0x2a2   :  { %v1355_v34 = vadd.f32 %v1354_v25, %v1212_v30  ;;  %v1502_v38 = vsub.f32 0.0, %v1286_v32  ;;  %v1509_v47 = vmul.f32 1.442695, %v1501_v41 }
 0x2a3   :  { %v1356_v27 = vpop.f32.mrf.mxu0 }
 0x2a4   :  { %v1357_v31 = vadd.f32 %v1356_v27, %v1212_v30  ;;  %v1503_v39 = vsub.f32 0.0, %v1355_v34  ;;  %v1511_v44 = vmul.f32 1.442695, %v1502_v38 }
 0x2a6   :  { %v1504_v36 = vsub.f32 0.0, %v1357_v31  ;;  %v1513_v45 = vmul.f32 1.442695, %v1503_v39 }
 0x2a8   :  { %v1515_v42 = vmul.f32 1.442695, %v1504_v36 }
 0x2aa   :  { %1881 = vpow2.f32 %v1515_v42 }
 0x2ab   :  { %1883 = vpow2.f32 %v1511_v44 }
 0x2ac   :  { %1885 = vpow2.f32 %v1513_v45 }
 0x2ad   :  { %1887 = vpow2.f32 %v1509_v47 }
 0x2b7   :  { %v1882_v58 = vpop.eup %1881 }
 0x2b8   :  { %v1884_v59 = vpop.eup %1883  ;;  %v1528_v62 = vadd.f32 1.0, %v1882_v58 }
 0x2b9   :  { %v1886_v60 = vpop.eup %1885  ;;  %v1526_v0 = vadd.f32 1.0, %v1884_v59 }
 0x2ba   :  { %v1888_v61 = vpop.eup %1887  ;;  %v1527_v1 = vadd.f32 1.0, %v1886_v60 }
 0x2bb   :  { %v1525_v3 = vadd.f32 1.0, %v1888_v61 }
 0x2dd   :  { %v1425_v29 = vpop.f32.mrf.mxu0 }
 0x2de   :  { %v1426_v40 = vadd.f32 %v1425_v29, %v1212_v30 }
 0x2df   :  { %v1427_v33 = vpop.f32.mrf.mxu0 }
 0x2e0   :  { %v1428_v37 = vadd.f32 %v1427_v33, %v1212_v30  ;;  %v1505_v46 = vsub.f32 0.0, %v1426_v40 }
 0x2e2   :  { %v1506_v43 = vsub.f32 0.0, %v1428_v37  ;;  %v1517_v49 = vmul.f32 1.442695, %v1505_v46 }
 0x2e4   :  { %v1519_v48 = vmul.f32 1.442695, %v1506_v43 }
 0x2e6   :  { %1889 = vpow2.f32 %v1519_v48 }
 0x2e7   :  { %1891 = vpow2.f32 %v1517_v49 }
 0x2f3   :  { %v1890_v63 = vpop.eup %1889 }
 0x2f4   :  { %v1892_v2 = vpop.eup %1891  ;;  %v1530_v4 = vadd.f32 1.0, %v1890_v63 }
 0x2f5   :  { %v1529_v5 = vadd.f32 1.0, %v1892_v2 }
 0x312   :  { %v1496_v50 = vpop.f32.mrf.mxu0 }
 0x313   :  { %v1497_v51 = vadd.f32 %v1496_v50, %v1212_v30 }
 0x314   :  { %v1498_v52 = vpop.f32.mrf.mxu0 }
 0x315   :  { %v1507_v53 = vsub.f32 0.0, %v1497_v51  ;;  %v1499_v54 = vadd.f32 %v1498_v52, %v1212_v30 }
 0x317   :  { %v1521_v55 = vmul.f32 1.442695, %v1507_v53  ;;  %v1508_v56 = vsub.f32 0.0, %v1499_v54 }
 0x319   :  { %1893 = vpow2.f32 %v1521_v55  ;;  %v1523_v57 = vmul.f32 1.442695, %v1508_v56 }
 0x31b   :  { %1895 = vpow2.f32 %v1523_v57 }
 0x31c   :  { %1897 = vrcp.f32 %v1528_v62 }
 0x31d   :  { %1899 = vrcp.f32 %v1526_v0 }
 0x31e   :  { %1901 = vrcp.f32 %v1527_v1 }
 0x31f   :  { %1903 = vrcp.f32 %v1525_v3 }
 0x320   :  { %1905 = vrcp.f32 %v1530_v4 }
 0x321   :  { %1907 = vrcp.f32 %v1529_v5 }
 0x326   :  { %v1894_v7 = vpop.eup %1893 }
 0x327   :  { %v1531_v8 = vadd.f32 1.0, %v1894_v7 }
 0x328   :  { %v1896_v10 = vpop.eup %1895 }
 0x329   :  { %v1532_v11 = vadd.f32 1.0, %v1896_v10  ;;  %1909 = vrcp.f32 %v1531_v8  ;;  %v1898_v14 = vpop.eup %1897 }
 0x32a   :  { %v1900_v28 = vpop.eup %1899 }
 0x32b   :  { %1911 = vrcp.f32 %v1532_v11  ;;  %v1902_v16 = vpop.eup %1901 }
 0x32c   :  { %v1904_v9 = vpop.eup %1903  ;;  %v1550_v17 = vcombine.low %v1902_v16, %v1898_v14 }
 0x32d   :  { %v1906_v18 = vpop.eup %1905  ;;  %v1549_v20 = vcombine.low %v1904_v9, %v1900_v28 }
 0x32e   :  { %v1908_v21 = vpop.eup %1907  ;;  %v1566_v26 = vrot.slane %v1550_v17, %v1558_v19 }
 0x32f   :  { %v1551_v25 = vcombine.low %v1908_v21, %v1906_v18  ;;  %v1559_v29 = vrot.slane %v1549_v20, %v1558_v19 }
 0x331   :  { %v1573_v30 = vrot.slane %v1551_v25, %v1558_v19  ;;  %v1581_v32 = vcombine.low %v1559_v29, %v1566_v26 }
 0x333   :  { %v1589_v34 = vrot.slane %v1581_v32, %v1558_v19 }
 0x336   :  { %v1910_v23 = vpop.eup %1909 }
 0x338   :  { %v1912_v6 = vpop.eup %1911 }
 0x339   :  { %v1552_v27 = vcombine.low %v1910_v23, %v1912_v6 }
 0x33b   :  { %v1580_v31 = vrot.slane %v1552_v27, %v1558_v19 }
 0x33d   :  { %v1582_v33 = vcombine.low %v1573_v30, %v1580_v31 }
 0x33f   :  { %v1596_v35 = vrot.slane %v1582_v33, %v1558_v19 }
 0x341   :  { %v1597_v36 = vcombine.low %v1589_v34, %v1596_v35 }
 0x343   :  { %1603 = vst.msk [vmem:[#allocation3] sm:$0xff] %vm1601_vm4, %v1597_v36 }
 0x344   :  { %1924 = shalt.err (!%p1921_p4)
}
 0x345   :  { %1613 = dma.vmem_to_hbm [thread:$0]  %s1611_s11, 128, %s2626_s7, [#allocation4]  }
 0x346   :  { %1933 = dma.done.wait [#allocation4], 128  }
 0x347   :  { %1934 = vsyncadd [#allocation4], 4294967168 }
 0x348   :  { %1617 = vsyncpa [#allocation4], 1 }

</bundles_post_ra>
